<compile_context>
chip_gen: v6e
topology: v6e:2x2x1
jax: 0.10.0
libtpu: 0.0.40
codegen_flags: <defaults>
</compile_context>

<pallas_src>
import functools

import jax
import jax.numpy as jnp
from jax.experimental import pallas as pl
from jax.experimental.pallas import tpu as pltpu


def _fire_kernel(params_ref, out_ref, *, eps, tq, num_heads):
    """params_ref (SMEM f32[2 + H]) = [c, L_sqrt, b_0, ..., b_{H-1}].

    out_ref is an (H, TQ, Sk) VMEM block of the (H, Sq, Sk) output.
    """
    i = pl.program_id(0)
    sk = out_ref.shape[-1]

    c = params_ref[0]
    l_sqrt = params_ref[1]

    # Default arange positions, generated in-kernel (batch = 1 path).
    q_base = (i * tq).astype(jnp.float32)
    qp = q_base + jax.lax.broadcasted_iota(jnp.int32, (tq, 1), 0).astype(
        jnp.float32)                                          # (TQ, 1)
    kp = jax.lax.broadcasted_iota(jnp.int32, (1, sk), 1).astype(
        jnp.float32)                                          # (1, Sk)

    rel = jnp.maximum(qp - kp, 0.0)                           # (TQ, Sk)
    # For arange k_pos (min k = 0) and qp >= 0: max_k clamp(qp - kp, 0) == qp.
    rmax = jnp.minimum(qp, l_sqrt * l_sqrt)                   # (TQ, 1)

    rel_log = jnp.log(jnp.abs(c * rel) + 1.0)                 # (TQ, Sk)
    rmax_log = jnp.log(jnp.abs(c * rmax) + 1.0)               # (TQ, 1)
    inv = 1.0 / (rmax_log + eps)                              # (TQ, 1)
    nd = rel_log * inv                                        # (TQ, Sk), >= 0

    # bias[h] = b[h] * nd  (rank-1 collapse of the bias-free MLP).
    # TODO(synk): the PyTorch reference casts rel to x.dtype before the logs;
    # this kernel computes in f32 and only casts the final store (exact for f32 x).
    for h in range(num_heads):
        out_ref[h, :, :] = (params_ref[2 + h] * nd).astype(out_ref.dtype)


def _choose_tq(sq, sk, num_heads, out_itemsize):
    """Largest query-row tile that fits a conservative VMEM budget."""
    budget = 16 * 1024 * 1024       # fits the default scoped VMEM everywhere
    per_row = 2 * num_heads * sk * out_itemsize + 4 * sk * 4   # 2x-buffered out + f32 temps
    tq = max(8, min(256, budget // max(per_row, 1)))
    if sq <= tq:
        return sq                   # single full-extent block
    tq -= tq % 8                    # sublane alignment
    return max(tq, 8)


def fire_forward(x, w1, w2, w3, c, l_sqrt, eps=1e-6, block_q=None):
    """FIRE bias. x: (..., Sq, Sk); like PyTorch, only its shape/dtype matter."""
    # TODO(synk): only the default q_pos/k_pos = arange (batch=1) path is implemented.
    sq, sk = x.shape[-2], x.shape[-1]
    num_heads = w3.shape[0]
    out_dtype = x.dtype

    # Rank-1 collapse of the bias-free MLP: b = W3 @ relu(W2 @ relu(W1[:, 0])).
    prec = jax.lax.Precision.HIGHEST
    h = jax.nn.relu(w1[:, 0].astype(jnp.float32))
    h = jax.nn.relu(jnp.dot(w2.astype(jnp.float32), h, precision=prec))
    b = jnp.dot(w3.astype(jnp.float32), h, precision=prec)    # (H,)

    params = jnp.concatenate(
        [jnp.array([c, l_sqrt], dtype=jnp.float32), b.astype(jnp.float32)])

    tq = block_q if block_q is not None else _choose_tq(
        sq, sk, num_heads, jnp.dtype(out_dtype).itemsize)
    grid = (pl.cdiv(sq, tq),)

    out = pl.pallas_call(
        functools.partial(_fire_kernel, eps=eps, tq=tq, num_heads=num_heads),
        out_shape=jax.ShapeDtypeStruct((num_heads, sq, sk), out_dtype),
        grid=grid,
        in_specs=[pl.BlockSpec(memory_space=pltpu.MemorySpace.SMEM)],
        out_specs=pl.BlockSpec((num_heads, tq, sk), lambda i: (0, i, 0)),
        compiler_params=pltpu.CompilerParams(
            dimension_semantics=("parallel",),
            vmem_limit_bytes=32 * 1024 * 1024),
    )(params)

    # (H, Sq, Sk) -> (1, H, Sq, Sk): adding the leading batch dim is free.
    return out[None]


def fire_reference(x, w1, w2, w3, c, l_sqrt, eps=1e-6):
    """Pure-JAX mirror of the PyTorch forward (default q_pos/k_pos path, full MLP)."""
    sq, sk = x.shape[-2], x.shape[-1]
    q_pos = jnp.arange(sq, dtype=jnp.float32)[None, :]
    k_pos = jnp.arange(sk, dtype=jnp.float32)[None, :]
    rel = q_pos[:, :, None] - k_pos[:, None, :]
    rel = jnp.maximum(rel, 0.0).astype(x.dtype)
    rmax = jnp.max(rel, axis=-1)
    rmax = jnp.minimum(rmax, l_sqrt ** 2)
    rel = jnp.log(jnp.abs(c * rel) + 1.0)
    rmax = jnp.log(jnp.abs(c * rmax) + 1.0)[..., None]
    nd = rel / (rmax + eps)
    h = nd[..., None]                                         # (1, Sq, Sk, 1)
    h = jax.nn.relu(jnp.matmul(h, w1.T, precision=jax.lax.Precision.HIGHEST))
    h = jax.nn.relu(jnp.matmul(h, w2.T, precision=jax.lax.Precision.HIGHEST))
    bias = jnp.matmul(h, w3.T, precision=jax.lax.Precision.HIGHEST)
    return jnp.transpose(bias, (0, 3, 1, 2))                  # (1, H, Sq, Sk)


if __name__ == "__main__":
    num_heads, mlp_hidden = 4, 32
    batch, seq = 2, 8
    c0, l0_sqrt, eps = 0.1, 16.0, 1e-6

    key = jax.random.PRNGKey(0)
    kx, k1, k2, k3 = jax.random.split(key, 4)
    # x plays the role of the attention-score tensor; only (.., Sq, Sk) is used.
    x = jax.random.normal(kx, (batch, num_heads, seq, seq), dtype=jnp.float32)
    # Deterministic parameter init (PyTorch nn.Linear weight layout: (out, in)).
    w1 = jax.random.normal(k1, (mlp_hidden, 1), dtype=jnp.float32) * 0.5
    w2 = jax.random.normal(k2, (mlp_hidden, mlp_hidden), dtype=jnp.float32) * (
        1.0 / mlp_hidden ** 0.5)
    w3 = jax.random.normal(k3, (num_heads, mlp_hidden), dtype=jnp.float32) * (
        1.0 / mlp_hidden ** 0.5)

    # Case 1: single-block path (TQ == Sq).
    out = fire_forward(x, w1, w2, w3, c0, l0_sqrt, eps)
    out = jax.block_until_ready(out)
    ref = fire_reference(x, w1, w2, w3, c0, l0_sqrt, eps)
    assert out.shape == (1, num_heads, seq, seq), out.shape
    assert jnp.allclose(out, ref, rtol=1e-4, atol=1e-4), float(
        jnp.max(jnp.abs(out - ref)))

    # Case 2: multi-block query grid (TQ < Sq) to exercise the tiled path.
    seq2 = 16
    x2 = jax.random.normal(kx, (1, num_heads, seq2, seq2), dtype=jnp.float32)
    out2 = fire_forward(x2, w1, w2, w3, c0, l0_sqrt, eps, block_q=8)
    out2 = jax.block_until_ready(out2)
    ref2 = fire_reference(x2, w1, w2, w3, c0, l0_sqrt, eps)
    assert out2.shape == (1, num_heads, seq2, seq2), out2.shape
    assert jnp.allclose(out2, ref2, rtol=1e-4, atol=1e-4), float(
        jnp.max(jnp.abs(out2 - ref2)))

    print("KERNEL_OK")
</pallas_src>

<mosaic_0001>
module attributes {stable_mosaic.version = 11 : i64} {
  func.func @_fire_kernel(%arg0: i32, %arg1: memref<6xf32, #tpu.memory_space<smem>>, %arg2: memref<4x8x8xf32, #tpu.memory_space<vmem>>) attributes {dimension_semantics = [#tpu.dimension_semantics<parallel>], iteration_bounds = array<i64: 1>, scalar_prefetch = 0 : i64, scratch_operands = 0 : i64, tpu.core_type = #tpu.core_type<tc>, window_params = [{transform_indices = @transform_0, window_bounds = array<i64: 6>}, {transform_indices = @transform_1, window_bounds = array<i64: 4, 8, 8>}]} {
    %c0 = arith.constant 0 : index
    %0 = memref.load %arg1[%c0] : memref<6xf32, #tpu.memory_space<smem>>
    %c1 = arith.constant 1 : index
    %1 = memref.load %arg1[%c1] : memref<6xf32, #tpu.memory_space<smem>>
    %c8_i32 = arith.constant 8 : i32
    %2 = arith.muli %arg0, %c8_i32 : i32
    %3 = arith.sitofp %2 : i32 to f32
    %4 = tpu.iota {dimensions = array<i32: 0>} : vector<8x1xi32>
    %5 = arith.sitofp %4 : vector<8x1xi32> to vector<8x1xf32>
    %6 = vector.broadcast %3 : f32 to vector<8x1xf32>
    %7 = arith.addf %6, %5 : vector<8x1xf32>
    %8 = tpu.iota {dimensions = array<i32: 1>} : vector<1x8xi32>
    %9 = arith.sitofp %8 : vector<1x8xi32> to vector<1x8xf32>
    %10 = vector.broadcast %7 : vector<8x1xf32> to vector<8x8xf32>
    %11 = vector.broadcast %9 : vector<1x8xf32> to vector<8x8xf32>
    %12 = arith.subf %10, %11 : vector<8x8xf32>
    %cst = arith.constant 0.000000e+00 : f32
    %13 = vector.broadcast %cst : f32 to vector<8x8xf32>
    %14 = arith.maximumf %12, %13 : vector<8x8xf32>
    %15 = arith.mulf %1, %1 : f32
    %16 = vector.broadcast %15 : f32 to vector<8x1xf32>
    %17 = arith.minimumf %7, %16 : vector<8x1xf32>
    %18 = vector.broadcast %0 : f32 to vector<8x8xf32>
    %19 = arith.mulf %18, %14 : vector<8x8xf32>
    %20 = math.absf %19 : vector<8x8xf32>
    %cst_0 = arith.constant 1.000000e+00 : f32
    %21 = vector.broadcast %cst_0 : f32 to vector<8x8xf32>
    %22 = arith.addf %20, %21 : vector<8x8xf32>
    %23 = math.log %22 : vector<8x8xf32>
    %24 = vector.broadcast %0 : f32 to vector<8x1xf32>
    %25 = arith.mulf %24, %17 : vector<8x1xf32>
    %26 = math.absf %25 : vector<8x1xf32>
    %cst_1 = arith.constant 1.000000e+00 : f32
    %27 = vector.broadcast %cst_1 : f32 to vector<8x1xf32>
    %28 = arith.addf %26, %27 : vector<8x1xf32>
    %29 = math.log %28 : vector<8x1xf32>
    %cst_2 = arith.constant 9.99999997E-7 : f32
    %30 = vector.broadcast %cst_2 : f32 to vector<8x1xf32>
    %31 = arith.addf %29, %30 : vector<8x1xf32>
    %cst_3 = arith.constant 1.000000e+00 : f32
    %32 = vector.broadcast %cst_3 : f32 to vector<8x1xf32>
    %33 = arith.divf %32, %31 : vector<8x1xf32>
    %34 = vector.broadcast %33 : vector<8x1xf32> to vector<8x8xf32>
    %35 = arith.mulf %23, %34 : vector<8x8xf32>
    %c2 = arith.constant 2 : index
    %36 = memref.load %arg1[%c2] : memref<6xf32, #tpu.memory_space<smem>>
    %37 = vector.broadcast %36 : f32 to vector<8x8xf32>
    %38 = arith.mulf %37, %35 : vector<8x8xf32>
    %c0_4 = arith.constant 0 : index
    %c0_5 = arith.constant 0 : index
    %c0_6 = arith.constant 0 : index
    %39 = vector.load %arg2[%c0_4, %c0_5, %c0_6] : memref<4x8x8xf32, #tpu.memory_space<vmem>>, vector<1x8x8xf32>
    %40 = vector.shape_cast %39 : vector<1x8x8xf32> to vector<8x8xf32>
    %41 = vector.shape_cast %38 : vector<8x8xf32> to vector<1x8x8xf32>
    tpu.vector_store %arg2[%c0_4, %c0_5, %c0_6], %41 {strides = array<i32>} : memref<4x8x8xf32, #tpu.memory_space<vmem>>, vector<1x8x8xf32>,
    %c3 = arith.constant 3 : index
    %42 = memref.load %arg1[%c3] : memref<6xf32, #tpu.memory_space<smem>>
    %43 = vector.broadcast %42 : f32 to vector<8x8xf32>
    %44 = arith.mulf %43, %35 : vector<8x8xf32>
    %c1_7 = arith.constant 1 : index
    %c0_8 = arith.constant 0 : index
    %c0_9 = arith.constant 0 : index
    %45 = vector.load %arg2[%c1_7, %c0_8, %c0_9] : memref<4x8x8xf32, #tpu.memory_space<vmem>>, vector<1x8x8xf32>
    %46 = vector.shape_cast %45 : vector<1x8x8xf32> to vector<8x8xf32>
    %47 = vector.shape_cast %44 : vector<8x8xf32> to vector<1x8x8xf32>
    tpu.vector_store %arg2[%c1_7, %c0_8, %c0_9], %47 {strides = array<i32>} : memref<4x8x8xf32, #tpu.memory_space<vmem>>, vector<1x8x8xf32>,
    %c4 = arith.constant 4 : index
    %48 = memref.load %arg1[%c4] : memref<6xf32, #tpu.memory_space<smem>>
    %49 = vector.broadcast %48 : f32 to vector<8x8xf32>
    %50 = arith.mulf %49, %35 : vector<8x8xf32>
    %c2_10 = arith.constant 2 : index
    %c0_11 = arith.constant 0 : index
    %c0_12 = arith.constant 0 : index
    %51 = vector.load %arg2[%c2_10, %c0_11, %c0_12] : memref<4x8x8xf32, #tpu.memory_space<vmem>>, vector<1x8x8xf32>
    %52 = vector.shape_cast %51 : vector<1x8x8xf32> to vector<8x8xf32>
    %53 = vector.shape_cast %50 : vector<8x8xf32> to vector<1x8x8xf32>
    tpu.vector_store %arg2[%c2_10, %c0_11, %c0_12], %53 {strides = array<i32>} : memref<4x8x8xf32, #tpu.memory_space<vmem>>, vector<1x8x8xf32>,
    %c5 = arith.constant 5 : index
    %54 = memref.load %arg1[%c5] : memref<6xf32, #tpu.memory_space<smem>>
    %55 = vector.broadcast %54 : f32 to vector<8x8xf32>
    %56 = arith.mulf %55, %35 : vector<8x8xf32>
    %c3_13 = arith.constant 3 : index
    %c0_14 = arith.constant 0 : index
    %c0_15 = arith.constant 0 : index
    %57 = vector.load %arg2[%c3_13, %c0_14, %c0_15] : memref<4x8x8xf32, #tpu.memory_space<vmem>>, vector<1x8x8xf32>
    %58 = vector.shape_cast %57 : vector<1x8x8xf32> to vector<8x8xf32>
    %59 = vector.shape_cast %56 : vector<8x8xf32> to vector<1x8x8xf32>
    tpu.vector_store %arg2[%c3_13, %c0_14, %c0_15], %59 {strides = array<i32>} : memref<4x8x8xf32, #tpu.memory_space<vmem>>, vector<1x8x8xf32>,
    return
  }
  func.func @transform_0(%arg0: i32) -> i32 {
    %c0_i32 = arith.constant 0 : i32
    %c0_i32_0 = arith.constant 0 : i32
    return %c0_i32 : i32
  }
  func.func @transform_1(%arg0: i32) -> (i32, i32, i32) {
    %c0_i32 = arith.constant 0 : i32
    %c0_i32_0 = arith.constant 0 : i32
    %c0_i32_1 = arith.constant 0 : i32
    return %c0_i32, %arg0, %c0_i32_0 : i32, i32, i32
  }
}

</mosaic_0001>

<bundles_post_ra>
// kernel: tpu_custom_call.1
= control target key start
LH: loop header
LB: loop body
LE: loop exit
PB: predicated region body
PF: predicated region fallthrough
CT: control target
= control target key end

     0   :  { %6 = vsyncpa [#allocation4], 0  ;;  %s156_s0 = inlined_call_operand.hbm [shape: f32[6], index: 0, kind: input, shape index: {}]   ;;  %s157_s1 = inlined_call_operand.hbm [shape: f32[4,8,8], index: 1, kind: output, shape index: {}]  }
   0x1   :  { %7 = vsyncpa [#allocation3], 0  ;;  %s136_s6 = smov [#allocation2]  }
   0x2   :  { %15 = dma.hbm_to_smem %s156_s0, 16, %s136_s6, [#allocation4]  }
   0x3   :  { %132 = dma.done.wait [#allocation4], 16  }
   0x4   :  { %133 = vsyncadd [#allocation4], 4294967280 }
   0x5   :  { %19 = sfence }
   0x6   :  { %s20_s9 = sld [smem:[#allocation2]]  ;;  %v24_v0 = vlaneseq  ;;  %s137_s15 = smov [#allocation5]   ;;  %vm55_vm0 = vcmask 64512  }
   0x7   :  { %s89_s10 = sld [smem:[#allocation2 + $0x1]]  ;;  %s77_s16 = sshll.u32 %s137_s15, 4  ;;  %s78_s16 = int_to_ptr.vmem [resolvable:$true] %s77_s16 }
   0x8   :  { %v25_v1 = vshrl.u32 %v24_v0, 7  ;;  %v30_v2 = vand.u32 127, %v24_v0  ;;  %s90_s0 = sld [smem:[#allocation2 + $0x2]]  ;;  %s112_s17 = scalar_lea.vmem %s78_s16, 512 }
   0x9   :  { %s91_s12 = sld [smem:[#allocation2 + $0x3]]  ;;  %p113_p0 = scmp.ne.s32.totalorder %s78_s16, %s112_s17 }
   0xa   :  { %v26_v3 = vcvt.s32.f32 %v25_v1  ;;  %v31_v4 = vcvt.s32.f32 %v30_v2  ;;  %s92_s13 = sld [smem:[#allocation2 + $0x4]]  ;;  %p117_p1 = scmp.lt.s32.totalorder %s78_s16, %s78_s16 }
   0xb   :  { %s93_s14 = sld [smem:[#allocation2 + $0x5]]  ;;  %p118_p2 = scmp.lt.s32.totalorder %s112_s17, %s112_s17 }
   0xc   :  { %v37_v6 = vstv %s20_s9  ;;  %v32_v7 = vsub.f32 %v26_v3, %v31_v4 }
   0xd   :  { %s34_s11 = smul.f32 %s89_s10, %s89_s10  ;;  %p119_p3 = por %p118_p2, %p117_p1 }
   0xe   :  { %v33_v10 = vmax.f32 %v32_v7, 0.0  ;;  %v53_v22 = vstv %s90_s0 }
   0xf   :  { %v35_v5 = vstv %s34_s11  ;;  %v58_v23 = vstv %s91_s12  ;;  %p120_p4 = pnand %p119_p3, %p113_p0 }
  0x10   :  { %v36_v8 = vmin.f32 %v26_v3, %v35_v5  ;;  %v38_v13 = vmul.f32 %v37_v6, %v33_v10  ;;  %v63_v24 = vstv %s92_s13 }
  0x11   :  { %v68_v25 = vstv %s93_s14 }
  0x12   :  { %v43_v9 = vmul.f32 %v37_v6, %v36_v8  ;;  %v39_v14 = vand.u32 2147483647, %v38_v13 }
  0x14   :  { %v44_v11 = vand.u32 2147483647, %v43_v9  ;;  %v40_v15 = vadd.f32 1.0, %v39_v14 }
  0x16   :  { %v45_v12 = vadd.f32 1.0, %v44_v11 }
  0x18   :  { %98 = vlog2.f32 %v45_v12 }
  0x19   :  { %100 = vlog2.f32 %v40_v15 }
  0x25   :  { %v99_v16 = vpop.eup %98 }
  0x26   :  { %v47_v17 = vmul.f32 0.6931472, %v99_v16  ;;  %v101_v19 = vpop.eup %100 }
  0x27   :  { %v42_v20 = vmul.f32 0.6931472, %v101_v19 }
  0x28   :  { %v48_v18 = vadd.f32 1e-06, %v47_v17 }
  0x2a   :  { %102 = vrcp.f32 %v48_v18 }
  0x37   :  { %v103_v21 = vpop.eup %102 }
  0x38   :  { %v51_v26 = vmul.f32 %v103_v21, %v42_v20 }
  0x3a   :  { %v54_v27 = vmul.f32 %v53_v22, %v51_v26  ;;  %v59_v28 = vmul.f32 %v58_v23, %v51_v26  ;;  %v64_v29 = vmul.f32 %v63_v24, %v51_v26  ;;  %v69_v30 = vmul.f32 %v68_v25, %v51_v26 }
  0x3c   :  { %56 = vst.msk [vmem:[#allocation5] sm:$0xff] %vm55_vm0, %v54_v27  ;;  %61 = vst.msk [vmem:[#allocation5 + $0x8] sm:$0xff] %vm55_vm0, %v59_v28 }
  0x3d   :  { %66 = vst.msk [vmem:[#allocation5 + $0x10] sm:$0xff] %vm55_vm0, %v64_v29  ;;  %71 = vst.msk [vmem:[#allocation5 + $0x18] sm:$0xff] %vm55_vm0, %v69_v30 }
  0x3e   :  { %123 = shalt.err (!%p120_p4)
}
  0x3f   :  { %s138_s18 = smov 128   ;;  %s139_s19 = smov 8  }
  0x40   :  { %83 = dma.vmem_to_hbm [thread:$0]  %s78_s16, 512, %s157_s1, [#allocation3], %s138_s18, %s138_s18, %s139_s19  }
  0x41   :  { %134 = dma.done.wait [#allocation3], 512  }
  0x42   :  { %135 = vsyncadd [#allocation3], 4294966784 }
  0x43   :  { %87 = vsyncpa [#allocation3], 1 }
  0x44   :  { %88 = vsyncpa [#allocation4], 1 }

</bundles_post_ra>
